<compile_context>
chip_gen: v7x
topology: tpu7x:2x2x1
jax: 0.10.0
libtpu: 0.0.40
codegen_flags: <defaults>
</compile_context>

<pallas_src>
import functools

import jax
import jax.numpy as jnp
from jax.experimental import pallas as pl
from jax.experimental.pallas import tpu as pltpu


def mlp_fused_kernel(x_ref, w1_ref, b1_ref, w2_ref, b2_ref, w3_ref, b3_ref, o_ref):
    """Fused 3-layer MLP: relu(x@W1+b1) -> relu(.@W2+b2) -> .@W3+b3 (f32 acc)."""
    x = x_ref[...].astype(jnp.bfloat16)  # in-kernel cast: avoids extra HBM pass

    a1 = jnp.dot(x, w1_ref[...], preferred_element_type=jnp.float32) + b1_ref[...]
    a1 = jnp.maximum(a1, 0.0).astype(jnp.bfloat16)
    # TODO(synk): Dropout layers of the wrapped model are deactivated (eval
    # mode) by ANN_Model.__init__, so they are intentionally identity here.

    a2 = jnp.dot(a1, w2_ref[...], preferred_element_type=jnp.float32) + b2_ref[...]
    a2 = jnp.maximum(a2, 0.0).astype(jnp.bfloat16)

    o_ref[...] = (
        jnp.dot(a2, w3_ref[...], preferred_element_type=jnp.float32) + b3_ref[...]
    )


def _round_up(n, m):
    return ((n + m - 1) // m) * m


@functools.partial(jax.jit, static_argnames=("batch_tile",))
def ann_model_forward(x, params, batch_tile=None):
    """Pallas forward for ANN_Model (eval-mode MLP).

    x: [B, d_in] float32
    params: dict with torch-style weights w{i}: [out, in], b{i}: [out]
    returns: [B, d_out] float32
    """
    B, d_in = x.shape
    h1 = params["w1"].shape[0]
    h2 = params["w2"].shape[0]
    d_out = params["w3"].shape[0]

    # --- batch tile selection (static, from shapes) ---------------------------
    b_eff = _round_up(max(B, 8), 8)
    if batch_tile is None:
        if b_eff <= 1024:
            tb = b_eff  # single grid step: per-step overhead dominates tiny MLP
        else:
            # >= 2 steps (v7x megacore), up to 2048 rows/step to amortize
            # the ~600-cycle per-step pipeline overhead.
            tb = min(2048, _round_up(pl.cdiv(b_eff, 2), 8))
    else:
        tb = _round_up(max(int(batch_tile), 8), 8)
    B_pad = _round_up(b_eff, tb)

    # --- wrapper glue: pad batch, torch-style transpose, bf16 weights ---------
    x_p = x if B_pad == B else jnp.pad(x, ((0, B_pad - B), (0, 0)))

    w1 = params["w1"].T.astype(jnp.bfloat16)   # [d_in, h1]
    w2 = params["w2"].T.astype(jnp.bfloat16)   # [h1, h2]
    w3 = params["w3"].T.astype(jnp.bfloat16)   # [h2, d_out]
    b1 = params["b1"][None, :].astype(jnp.float32)   # [1, h1]
    b2 = params["b2"][None, :].astype(jnp.float32)   # [1, h2]
    b3 = params["b3"][None, :].astype(jnp.float32)   # [1, d_out]

    grid_spec = pltpu.PrefetchScalarGridSpec(
        num_scalar_prefetch=0,
        grid=(B_pad // tb,),
        in_specs=[
            pl.BlockSpec((tb, d_in), lambda i: (i, 0)),     # x tile over batch
            pl.BlockSpec((d_in, h1), lambda i: (0, 0)),     # W1 (grid-resident)
            pl.BlockSpec((1, h1), lambda i: (0, 0)),        # b1
            pl.BlockSpec((h1, h2), lambda i: (0, 0)),       # W2
            pl.BlockSpec((1, h2), lambda i: (0, 0)),        # b2
            pl.BlockSpec((h2, d_out), lambda i: (0, 0)),    # W3
            pl.BlockSpec((1, d_out), lambda i: (0, 0)),     # b3
        ],
        out_specs=pl.BlockSpec((tb, d_out), lambda i: (i, 0)),
    )

    out = pl.pallas_call(
        mlp_fused_kernel,
        out_shape=jax.ShapeDtypeStruct((B_pad, d_out), jnp.float32),
        grid_spec=grid_spec,
        compiler_params=pltpu.CompilerParams(
            dimension_semantics=("parallel",),
        ),
    )(x_p, w1, b1, w2, b2, w3, b3)

    return out if B_pad == B else out[:B]


def init_params(key, d_in=32, h1=64, h2=64, d_out=4):
    """Deterministic torch-style (Kaiming-uniform-ish) init of the wrapped MLP."""
    ks = jax.random.split(key, 6)

    def lin(kw, kb, fan_in, fan_out):
        bound = 1.0 / jnp.sqrt(fan_in)
        w = jax.random.uniform(kw, (fan_out, fan_in), jnp.float32, -bound, bound)
        b = jax.random.uniform(kb, (fan_out,), jnp.float32, -bound, bound)
        return w, b

    w1, b1 = lin(ks[0], ks[1], d_in, h1)
    w2, b2 = lin(ks[2], ks[3], h1, h2)
    w3, b3 = lin(ks[4], ks[5], h2, d_out)
    return {"w1": w1, "b1": b1, "w2": w2, "b2": b2, "w3": w3, "b3": b3}


def reference_forward(x, params):
    """Pure-JAX f32 reference of the same eval-mode MLP (dropout = identity)."""
    h = jnp.maximum(x @ params["w1"].T + params["b1"], 0.0)
    h = jnp.maximum(h @ params["w2"].T + params["b2"], 0.0)
    return h @ params["w3"].T + params["b3"]


if __name__ == "__main__":
    key = jax.random.PRNGKey(0)
    k_x, k_p = jax.random.split(key)

    B, D_IN = 8, 32
    x = jax.random.normal(k_x, (B, D_IN), dtype=jnp.float32)
    params = init_params(k_p, d_in=D_IN, h1=64, h2=64, d_out=4)

    out = ann_model_forward(x, params)
    out = jax.block_until_ready(out)

    ref = reference_forward(x, params)
    assert out.shape == ref.shape == (B, 4)
    # bf16 weights/activations with f32 accumulation: bf16-level tolerance.
    assert jnp.allclose(out, ref, atol=2e-2, rtol=2e-2), (
        f"max abs err {jnp.max(jnp.abs(out - ref))}"
    )

    print("KERNEL_OK")
</pallas_src>

<mosaic_0001>
module attributes {stable_mosaic.version = 11 : i64} {
  func.func @mlp_fused_kernel(%arg0: i32, %arg1: memref<8x32xf32, #tpu.memory_space<vmem>>, %arg2: memref<32x64xbf16, #tpu.memory_space<vmem>>, %arg3: memref<1x64xf32, #tpu.memory_space<vmem>>, %arg4: memref<64x64xbf16, #tpu.memory_space<vmem>>, %arg5: memref<1x64xf32, #tpu.memory_space<vmem>>, %arg6: memref<64x4xbf16, #tpu.memory_space<vmem>>, %arg7: memref<1x4xf32, #tpu.memory_space<vmem>>, %arg8: memref<8x4xf32, #tpu.memory_space<vmem>>) attributes {dimension_semantics = [#tpu.dimension_semantics<parallel>], iteration_bounds = array<i64: 1>, scalar_prefetch = 0 : i64, scratch_operands = 0 : i64, tpu.core_type = #tpu.core_type<tc>, window_params = [{transform_indices = @transform_0, window_bounds = array<i64: 8, 32>}, {pipeline_mode = #tpu.pipeline_mode<synchronous>, transform_indices = @transform_1, window_bounds = array<i64: 32, 64>}, {pipeline_mode = #tpu.pipeline_mode<synchronous>, transform_indices = @transform_2, window_bounds = array<i64: 1, 64>}, {pipeline_mode = #tpu.pipeline_mode<synchronous>, transform_indices = @transform_3, window_bounds = array<i64: 64, 64>}, {pipeline_mode = #tpu.pipeline_mode<synchronous>, transform_indices = @transform_4, window_bounds = array<i64: 1, 64>}, {pipeline_mode = #tpu.pipeline_mode<synchronous>, transform_indices = @transform_5, window_bounds = array<i64: 64, 4>}, {pipeline_mode = #tpu.pipeline_mode<synchronous>, transform_indices = @transform_6, window_bounds = array<i64: 1, 4>}, {transform_indices = @transform_7, window_bounds = array<i64: 8, 4>}]} {
    %c0 = arith.constant 0 : index
    %c0_0 = arith.constant 0 : index
    %0 = vector.load %arg1[%c0, %c0_0] : memref<8x32xf32, #tpu.memory_space<vmem>>, vector<8x32xf32>
    %1 = arith.truncf %0 : vector<8x32xf32> to vector<8x32xbf16>
    %c0_1 = arith.constant 0 : index
    %c0_2 = arith.constant 0 : index
    %2 = vector.load %arg2[%c0_1, %c0_2] : memref<32x64xbf16, #tpu.memory_space<vmem>>, vector<32x64xbf16>
    %cst = arith.constant dense<0.000000e+00> : vector<8x64xf32>
    %3 = tpu.matmul %1, %2, %cst {dimension_numbers = #tpu.dot_dimension_numbers<[1], [0], [0], [1], [0, 0, 1, 1], [], []>} : vector<8x32xbf16>, vector<32x64xbf16>, vector<8x64xf32> -> vector<8x64xf32>
    %c0_3 = arith.constant 0 : index
    %c0_4 = arith.constant 0 : index
    %4 = vector.load %arg3[%c0_3, %c0_4] : memref<1x64xf32, #tpu.memory_space<vmem>>, vector<1x64xf32>
    %5 = vector.broadcast %4 : vector<1x64xf32> to vector<8x64xf32>
    %6 = arith.addf %3, %5 : vector<8x64xf32>
    %cst_5 = arith.constant 0.000000e+00 : f32
    %7 = vector.broadcast %cst_5 : f32 to vector<8x64xf32>
    %8 = arith.maximumf %6, %7 : vector<8x64xf32>
    %9 = arith.truncf %8 : vector<8x64xf32> to vector<8x64xbf16>
    %c0_6 = arith.constant 0 : index
    %c0_7 = arith.constant 0 : index
    %10 = vector.load %arg4[%c0_6, %c0_7] : memref<64x64xbf16, #tpu.memory_space<vmem>>, vector<64x64xbf16>
    %cst_8 = arith.constant dense<0.000000e+00> : vector<8x64xf32>
    %11 = tpu.matmul %9, %10, %cst_8 {dimension_numbers = #tpu.dot_dimension_numbers<[1], [0], [0], [1], [0, 0, 1, 1], [], []>} : vector<8x64xbf16>, vector<64x64xbf16>, vector<8x64xf32> -> vector<8x64xf32>
    %c0_9 = arith.constant 0 : index
    %c0_10 = arith.constant 0 : index
    %12 = vector.load %arg5[%c0_9, %c0_10] : memref<1x64xf32, #tpu.memory_space<vmem>>, vector<1x64xf32>
    %13 = vector.broadcast %12 : vector<1x64xf32> to vector<8x64xf32>
    %14 = arith.addf %11, %13 : vector<8x64xf32>
    %cst_11 = arith.constant 0.000000e+00 : f32
    %15 = vector.broadcast %cst_11 : f32 to vector<8x64xf32>
    %16 = arith.maximumf %14, %15 : vector<8x64xf32>
    %17 = arith.truncf %16 : vector<8x64xf32> to vector<8x64xbf16>
    %c0_12 = arith.constant 0 : index
    %c0_13 = arith.constant 0 : index
    %18 = vector.load %arg6[%c0_12, %c0_13] : memref<64x4xbf16, #tpu.memory_space<vmem>>, vector<64x4xbf16>
    %cst_14 = arith.constant dense<0.000000e+00> : vector<8x4xf32>
    %19 = tpu.matmul %17, %18, %cst_14 {dimension_numbers = #tpu.dot_dimension_numbers<[1], [0], [0], [1], [0, 0, 1, 1], [], []>} : vector<8x64xbf16>, vector<64x4xbf16>, vector<8x4xf32> -> vector<8x4xf32>
    %c0_15 = arith.constant 0 : index
    %c0_16 = arith.constant 0 : index
    %20 = vector.load %arg7[%c0_15, %c0_16] : memref<1x4xf32, #tpu.memory_space<vmem>>, vector<1x4xf32>
    %21 = vector.broadcast %20 : vector<1x4xf32> to vector<8x4xf32>
    %22 = arith.addf %19, %21 : vector<8x4xf32>
    %c0_17 = arith.constant 0 : index
    %c0_18 = arith.constant 0 : index
    %23 = vector.load %arg8[%c0_17, %c0_18] : memref<8x4xf32, #tpu.memory_space<vmem>>, vector<8x4xf32>
    tpu.vector_store %arg8[%c0_17, %c0_18], %22 {strides = array<i32>} : memref<8x4xf32, #tpu.memory_space<vmem>>, vector<8x4xf32>,
    return
  }
  func.func @transform_0(%arg0: i32) -> (i32, i32) {
    %c0_i32 = arith.constant 0 : i32
    %c0_i32_0 = arith.constant 0 : i32
    return %arg0, %c0_i32 : i32, i32
  }
  func.func @transform_1(%arg0: i32) -> (i32, i32) {
    %c0_i32 = arith.constant 0 : i32
    %c0_i32_0 = arith.constant 0 : i32
    %c0_i32_1 = arith.constant 0 : i32
    return %c0_i32, %c0_i32_0 : i32, i32
  }
  func.func @transform_2(%arg0: i32) -> (i32, i32) {
    %c0_i32 = arith.constant 0 : i32
    %c0_i32_0 = arith.constant 0 : i32
    %c0_i32_1 = arith.constant 0 : i32
    return %c0_i32, %c0_i32_0 : i32, i32
  }
  func.func @transform_3(%arg0: i32) -> (i32, i32) {
    %c0_i32 = arith.constant 0 : i32
    %c0_i32_0 = arith.constant 0 : i32
    %c0_i32_1 = arith.constant 0 : i32
    return %c0_i32, %c0_i32_0 : i32, i32
  }
  func.func @transform_4(%arg0: i32) -> (i32, i32) {
    %c0_i32 = arith.constant 0 : i32
    %c0_i32_0 = arith.constant 0 : i32
    %c0_i32_1 = arith.constant 0 : i32
    return %c0_i32, %c0_i32_0 : i32, i32
  }
  func.func @transform_5(%arg0: i32) -> (i32, i32) {
    %c0_i32 = arith.constant 0 : i32
    %c0_i32_0 = arith.constant 0 : i32
    %c0_i32_1 = arith.constant 0 : i32
    return %c0_i32, %c0_i32_0 : i32, i32
  }
  func.func @transform_6(%arg0: i32) -> (i32, i32) {
    %c0_i32 = arith.constant 0 : i32
    %c0_i32_0 = arith.constant 0 : i32
    %c0_i32_1 = arith.constant 0 : i32
    return %c0_i32, %c0_i32_0 : i32, i32
  }
  func.func @transform_7(%arg0: i32) -> (i32, i32) {
    %c0_i32 = arith.constant 0 : i32
    %c0_i32_0 = arith.constant 0 : i32
    return %arg0, %c0_i32 : i32, i32
  }
}

</mosaic_0001>

<bundles_post_ra>
// kernel: ann_model_forward.1
= control target key start
LH: loop header
LB: loop body
LE: loop exit
PB: predicated region body
PF: predicated region fallthrough
CT: control target
= control target key end

     0   :  { %v344_v0 = vmov 0.0   ;;  %vm345_vm0 = vmmov 0   ;;  %vm52_vm1 = vcmask 261120   ;;  %vm137_vm2 = vcmask 523264   ;;  %s436_s1 = inlined_call_operand.vmem [shape: bf16[32,64], index: 1, kind: input, shape index: {}]   ;;  %s437_s0 = inlined_call_operand.vmem [shape: f32[8,32], index: 0, kind: input, shape index: {}]   ;;  %s438_s3 = inlined_call_operand.vmem [shape: bf16[64,64], index: 3, kind: input, shape index: {}]   ;;  %s439_s5 = inlined_call_operand.vmem [shape: bf16[64,4], index: 5, kind: input, shape index: {}]   ;;  %s440_s2 = inlined_call_operand.vmem [shape: f32[1,64], index: 2, kind: input, shape index: {}]   ;;  %s441_s4 = inlined_call_operand.vmem [shape: f32[1,64], index: 4, kind: input, shape index: {}]   ;;  %s442_s6 = inlined_call_operand.vmem [shape: f32[1,4], index: 6, kind: input, shape index: {}]   ;;  %s443_s7 = inlined_call_operand.vmem [shape: f32[8,4], index: 7, kind: output, shape index: {}]  }
   0x1   :  { %300 = vmatprep.subr.bf16.mxu0 %v344_v0  ;;  %v334_v1 = vld [vmem:[%s436_s1] sm:$0xff]   ;;  %304 = vmatprep.mubr.msk.bf16.mxu0 %vm345_vm0, %v344_v0  ;;  %v335_v2 = vld [vmem:[%s436_s1 + $0x8] sm:$0xff]   ;;  %v338_v7 = vld [vmem:[%s438_s3 + $0x10] sm:$0xff]   ;;  %vm265_vm3 = vcmask 31744  }
   0x2   :  { %308 = vmatprep.subr.bf16.mxu1 %v344_v0  ;;  %316 = vmatprep.mubr.msk.bf16.mxu1 %vm345_vm0, %v344_v0  ;;  %v27_v3 = vld [vmem:[%s437_s0] sm:$0xff]  ;;  %v337_v5 = vld [vmem:[%s438_s3 + $0x8] sm:$0xff]   ;;  %v339_v8 = vld [vmem:[%s438_s3 + $0x18] sm:$0xff]  }
   0x3   :  { %301 = vmatpush3.bf16.msra.mxu0 %v334_v1  ;;  %v336_v4 = vld [vmem:[%s438_s3] sm:$0xff]   ;;  %v28_v6 = vpack.c.bf16 %v27_v3, %v27_v3  ;;  %v341_v10 = vld [vmem:[%s439_s5 + $0x8] sm:$0xff]   ;;  %v342_v19 = vld [vmem:[%s439_s5 + $0x10] sm:$0xff]  }
   0x4   :  { %302 = vmatprep.subr.bf16.mxu0 %v344_v0  ;;  %309 = vmatpush3.bf16.msra.mxu1 %v336_v4  ;;  %v340_v9 = vld [vmem:[%s439_s5] sm:$0xff]   ;;  %v343_v20 = vld [vmem:[%s439_s5 + $0x18] sm:$0xff]  }
   0x5   :  { %310 = vmatprep.subr.bf16.mxu1 %v344_v0  ;;  %v271_v11 = vld [vmem:[%s440_s2] ss:$0 sm:$0xff] }
   0x6   :  { %v275_v21 = vld [vmem:[%s441_s4] ss:$0 sm:$0xff] }
   0x7   :  { %303 = vmatpush3.bf16.msra.mxu0 %v335_v2  ;;  %v281_v29 = vld [vmem:[%s442_s6] ss:$0 sm:$0xff] }
   0x8   :  { %320 = vmatprep.subr.bf16.mxu0 %v344_v0  ;;  %311 = vmatpush3.bf16.msra.mxu1 %v337_v5 }
   0x9   :  { %312 = vmatprep.subr.bf16.mxu1 %v344_v0 }
   0xa   :  { %305 = vmatmul.mubr.msk.bf16.vlgmr.msra.gmra.mrb[0].mxu0 %vm52_vm1, %v28_v6 }
   0xb   :  { %328 = vmatprep.mubr.msk.bf16.mxu0 %vm345_vm0, %v344_v0  ;;  %321 = vmatpush3.bf16.msra.mxu0 %v340_v9 }
   0xc   :  { %313 = vmatpush3.bf16.msra.mxu1 %v338_v7  ;;  %322 = vmatprep.subr.bf16.mxu0 %v344_v0 }
   0xd   :  { %314 = vmatprep.subr.bf16.mxu1 %v344_v0 }
   0xf   :  { %323 = vmatpush3.bf16.msra.mxu0 %v341_v10 }
  0x10   :  { %315 = vmatpush3.bf16.msra.mxu1 %v339_v8  ;;  %324 = vmatprep.subr.bf16.mxu0 %v344_v0 }
  0x13   :  { %325 = vmatpush3.bf16.msra.mxu0 %v342_v19 }
  0x14   :  { %326 = vmatprep.subr.bf16.mxu0 %v344_v0 }
  0x17   :  { %327 = vmatpush3.bf16.msra.mxu0 %v343_v20 }
  0xdd   :  { %v90_v12 = vpop.f32.mrb[0].mxu0 }
  0xde   :  { %v91_v13 = vadd.f32 %v271_v11, %v90_v12  ;;  %v306_v14 = vpop.f32.mrb[1].mxu0 }
  0xdf   :  { %v93_v15 = vpop.f32.mrb[2].mxu0 }
  0xe0   :  { %v96_v16 = vmax.f32 %v91_v13, 0.0  ;;  %v307_v17 = vpop.f32.mrb[3].mxu0 }
  0xe2   :  { %v97_v18 = vpack.c.bf16 %v96_v16, %v96_v16 }
  0xe4   :  { %317 = vmatmul.mubr.msk.bf16.vlgmr.msra.gmra.mrb[0].mxu1 %vm137_vm2, %v97_v18 }
 0x1b7   :  { %v175_v22 = vpop.f32.mrb[0].mxu1 }
 0x1b8   :  { %v176_v23 = vadd.f32 %v275_v21, %v175_v22  ;;  %v318_v24 = vpop.f32.mrb[1].mxu1 }
 0x1b9   :  { %v178_v25 = vpop.f32.mrb[2].mxu1 }
 0x1ba   :  { %v181_v26 = vmax.f32 %v176_v23, 0.0  ;;  %v319_v27 = vpop.f32.mrb[3].mxu1 }
 0x1bc   :  { %v182_v28 = vpack.c.bf16 %v181_v26, %v181_v26 }
 0x1be   :  { %329 = vmatmul.mubr.msk.bf16.vlgmr.msra.gmra.mrb[4].mxu0 %vm137_vm2, %v182_v28 }
 0x291   :  { %v259_v30 = vpop.f32.mrb[4].mxu0 }
 0x292   :  { %v260_v31 = vadd.f32 %v281_v29, %v259_v30  ;;  %v330_v32 = vpop.f32.mrb[5].mxu0 }
 0x293   :  { %v262_v33 = vpop.f32.mrb[6].mxu0 }
 0x294   :  { %266 = vst.msk [vmem:[%s443_s7] sm:$0xff] %vm265_vm3, %v260_v31  ;;  %v331_v34 = vpop.f32.mrb[7].mxu0 }

</bundles_post_ra>
